<compile_context>
chip_gen: v7x
topology: tpu7x:2x2x1
jax: 0.10.0
libtpu: 0.0.40
codegen_flags: <defaults>
</compile_context>

<pallas_src>
import jax
import jax.numpy as jnp
from jax.experimental import pallas as pl
from jax.experimental.pallas import tpu as pltpu

_TARGET_TILE_BYTES = 4 * 1024 * 1024   # ~4 MiB/tile: 4 double-buffered tiles fit
                                       # easily in v5e/v6e (128 MiB) and v7x (64 MiB)
_MAX_COLS = 1024                       # lane-dense last-dim cap (multiple of 128)
_VMEM_CAP = 40 * 1024 * 1024           # stay well under v7x scoped/physical VMEM


def _round_up(a, b):
    return (a + b - 1) // b * b


def _toy_kernel(theta_ref, x_ref, o_ref):
    # theta_ref lives in SMEM: theta_ref[0] = theta1, theta_ref[1] = theta2
    t1 = theta_ref[0]
    t2 = theta_ref[1]
    x = x_ref[...]
    # -t1*x^2 + t2*x  ==  x * (t2 - t1*x)   (3 VALU ops/elem; HBM-bound anyway)
    o_ref[...] = (x * (t2 - t1 * x)).astype(o_ref.dtype)


def _pick_cols(n):
    """Largest multiple of 128 (<= _MAX_COLS) that exactly divides n, else 0."""
    c = (min(n, _MAX_COLS) // 128) * 128
    while c >= 128:
        if n % c == 0:
            return c
        c -= 128
    return 0


def _pick_tile_rows(rows, cols, itemsize):
    """Rows per tile: ~4 MiB, sublane-aligned, >=2 balanced programs when possible."""
    sub = max(8, 32 // itemsize)             # 8 for f32, 16 for bf16, 32 for int8
    row_bytes = cols * itemsize
    cap = max(sub, (_TARGET_TILE_BYTES // row_bytes) // sub * sub)
    if rows <= sub:
        return rows                          # single block equal to the full dim
    if rows <= 2 * cap:
        # Fits in <= 2 tiles: split into 2 balanced programs (v7x megacore).
        return min(cap, _round_up(pl.cdiv(rows, 2), sub))
    return cap


def _run_2d(x2d, theta, tile_r, out_dtype):
    rows, cols = x2d.shape
    grid = (pl.cdiv(rows, tile_r),)          # ragged grid: partial last block OK
    itemsize = max(x2d.dtype.itemsize, jnp.dtype(out_dtype).itemsize)
    tile_bytes = tile_r * cols * itemsize
    # 2x double-buffered input + 2x output tiles + headroom, capped for v7x.
    vmem_limit = min(_VMEM_CAP,
                     max(16 * 1024 * 1024, 4 * tile_bytes + 4 * 1024 * 1024))
    return pl.pallas_call(
        _toy_kernel,
        out_shape=jax.ShapeDtypeStruct((rows, cols), out_dtype),
        grid=grid,
        in_specs=[
            pl.BlockSpec(memory_space=pltpu.MemorySpace.SMEM),   # theta scalars
            pl.BlockSpec((tile_r, cols), lambda i: (i, 0)),      # x tile
        ],
        out_specs=pl.BlockSpec((tile_r, cols), lambda i: (i, 0)),
        compiler_params=pltpu.CompilerParams(
            dimension_semantics=("parallel",),
            vmem_limit_bytes=int(vmem_limit),
        ),
    )(theta, x2d)


def toy_model_forward(x, theta1, theta2):
    """Elementwise -theta1*x**2 + theta2*x for any-shaped x."""
    theta = jnp.stack([jnp.asarray(theta1, jnp.float32),
                       jnp.asarray(theta2, jnp.float32)])

    orig_shape = x.shape
    # Matches PyTorch: 0-dim f32 parameters don't up-promote a bf16 tensor,
    # so the output keeps x's dtype (compute happens in f32 in-kernel).
    out_dtype = x.dtype
    n = x.size
    if n == 0:
        return jnp.zeros(orig_shape, out_dtype)

    itemsize = jnp.dtype(x.dtype).itemsize
    cols = _pick_cols(n)
    if cols:
        # Common path: pure reshape (free for contiguous arrays), no pad/slice.
        rows = n // cols
        tile_r = _pick_tile_rows(rows, cols, itemsize)
        out2d = _run_2d(x.reshape(rows, cols), theta, tile_r, out_dtype)
        return out2d.reshape(orig_shape)

    # Rare path (size not a multiple of 128): pad the flat tail with zeros
    # (safe: f(0) == 0) and slice it back off afterwards.
    cols = 128
    padded_n = _round_up(n, cols)
    flat = jnp.pad(x.reshape(-1), (0, padded_n - n))
    rows = padded_n // cols
    tile_r = _pick_tile_rows(rows, cols, itemsize)
    out2d = _run_2d(flat.reshape(rows, cols), theta, tile_r, out_dtype)
    return out2d.reshape(-1)[:n].reshape(orig_shape)


if __name__ == "__main__":
    # Parameters match nn.Parameter(torch.tensor(0.5)) / (-0.5)
    theta1 = jnp.float32(0.5)
    theta2 = jnp.float32(-0.5)

    # Small deterministic input (generic 4-D tensor, like an NCHW activation)
    key = jax.random.PRNGKey(0)
    x = jax.random.normal(key, (2, 4, 16, 16), dtype=jnp.float32)

    out = toy_model_forward(x, theta1, theta2)
    out = jax.block_until_ready(out)

    # Reference check in plain JAX (same expression as the PyTorch module)
    ref = -theta1 * x ** 2 + theta2 * x
    assert out.shape == x.shape
    assert out.dtype == x.dtype
    assert jnp.allclose(out, ref, atol=1e-5, rtol=1e-5)

    print("KERNEL_OK")
</pallas_src>

<mosaic_0001>
module attributes {stable_mosaic.version = 11 : i64} {
  func.func @_toy_kernel(%arg0: i32, %arg1: memref<2xf32, #tpu.memory_space<smem>>, %arg2: memref<2x1024xf32, #tpu.memory_space<vmem>>, %arg3: memref<2x1024xf32, #tpu.memory_space<vmem>>) attributes {dimension_semantics = [#tpu.dimension_semantics<parallel>], iteration_bounds = array<i64: 1>, scalar_prefetch = 0 : i64, scratch_operands = 0 : i64, tpu.core_type = #tpu.core_type<tc>, window_params = [{transform_indices = @transform_0, window_bounds = array<i64: 2>}, {transform_indices = @transform_1, window_bounds = array<i64: 2, 1024>}, {transform_indices = @transform_2, window_bounds = array<i64: 2, 1024>}]} {
    %c0 = arith.constant 0 : index
    %0 = memref.load %arg1[%c0] : memref<2xf32, #tpu.memory_space<smem>>
    %c1 = arith.constant 1 : index
    %1 = memref.load %arg1[%c1] : memref<2xf32, #tpu.memory_space<smem>>
    %c0_0 = arith.constant 0 : index
    %c0_1 = arith.constant 0 : index
    %2 = vector.load %arg2[%c0_0, %c0_1] : memref<2x1024xf32, #tpu.memory_space<vmem>>, vector<2x1024xf32>
    %3 = vector.broadcast %0 : f32 to vector<2x1024xf32>
    %4 = arith.mulf %3, %2 : vector<2x1024xf32>
    %5 = vector.broadcast %1 : f32 to vector<2x1024xf32>
    %6 = arith.subf %5, %4 : vector<2x1024xf32>
    %7 = arith.mulf %2, %6 : vector<2x1024xf32>
    %c0_2 = arith.constant 0 : index
    %c0_3 = arith.constant 0 : index
    %8 = vector.load %arg3[%c0_2, %c0_3] : memref<2x1024xf32, #tpu.memory_space<vmem>>, vector<2x1024xf32>
    tpu.vector_store %arg3[%c0_2, %c0_3], %7 {strides = array<i32>} : memref<2x1024xf32, #tpu.memory_space<vmem>>, vector<2x1024xf32>,
    return
  }
  func.func @transform_0(%arg0: i32) -> i32 {
    %c0_i32 = arith.constant 0 : i32
    %c0_i32_0 = arith.constant 0 : i32
    return %c0_i32 : i32
  }
  func.func @transform_1(%arg0: i32) -> (i32, i32) {
    %c0_i32 = arith.constant 0 : i32
    %c0_i32_0 = arith.constant 0 : i32
    return %arg0, %c0_i32 : i32, i32
  }
  func.func @transform_2(%arg0: i32) -> (i32, i32) {
    %c0_i32 = arith.constant 0 : i32
    %c0_i32_0 = arith.constant 0 : i32
    return %arg0, %c0_i32 : i32, i32
  }
}

</mosaic_0001>

<bundles_post_ra>
// kernel: tpu_custom_call.1
= control target key start
LH: loop header
LB: loop body
LE: loop exit
PB: predicated region body
PF: predicated region fallthrough
CT: control target
= control target key end

     0   :  { %7 = vsyncpa [#allocation5], 0  ;;  %s183_s0 = inlined_call_operand.hbm [shape: f32[2], index: 0, kind: input, shape index: {}]   ;;  %s184_s1 = inlined_call_operand.hbm [shape: f32[2,1024], index: 1, kind: input, shape index: {}]   ;;  %s185_s2 = inlined_call_operand.hbm [shape: f32[2,1024], index: 2, kind: output, shape index: {}]  }
   0x1   :  { %8 = vsyncpa [#allocation3], 0 }
   0x2   :  { %9 = vsyncpa [#allocation4], 0  ;;  %s69_s11 = scalar_lea.hbm %s183_s0, 16 }
   0x3   :  { %p70_p0 = scmp.ne.s32.totalorder %s183_s0, %s69_s11  ;;  %p73_p1 = scmp.lt.u32.totalorder %s69_s11, %s183_s0 }
   0x5   :  { %p75_p2 = pnand %p73_p1, %p70_p0 }
   0x7   :  { %78 = shalt.err (!%p75_p2)
}
   0x8   :  { %s129_s16 = smov [#allocation2]   ;;  %s130_s19 = smov [#allocation6]  }
   0x9   :  { %17 = dma.hbm_to_smem %s183_s0, 16, %s129_s16, [#allocation5]  }
   0xa   :  { %s24_s20 = sshll.u32 %s130_s19, 4  ;;  %s79_s23 = scalar_lea.hbm %s184_s1, 256  ;;  %s25_s20 = int_to_ptr.vmem [resolvable:$true] %s24_s20 }
   0xb   :  { %p80_p3 = scmp.ne.s32.totalorder %s184_s1, %s79_s23  ;;  %p83_p4 = scmp.lt.u32.totalorder %s79_s23, %s184_s1 }
   0xd   :  { %p85_p5 = pnand %p83_p4, %p80_p3 }
   0xf   :  { %88 = shalt.err (!%p85_p5)
}
  0x10   :  { %s89_s28 = scalar_lea.vmem %s25_s20, 256  ;;  %p94_p7 = scmp.lt.s32.totalorder %s25_s20, %s25_s20 }
  0x11   :  { %p90_p6 = scmp.ne.s32.totalorder %s25_s20, %s89_s28  ;;  %p95_p8 = scmp.lt.s32.totalorder %s89_s28, %s89_s28 }
  0x13   :  { %p96_p9 = por %p95_p8, %p94_p7 }
  0x15   :  { %p97_p10 = pnand %p96_p9, %p90_p6 }
  0x17   :  { %100 = shalt.err (!%p97_p10)
}
  0x18   :  { %27 = dma.hbm_to_vmem [thread:$0]  %s184_s1, 256, %s25_s20, [#allocation3]  }
  0x19   :  { %123 = dma.done.wait [#allocation5], 16  }
  0x1a   :  { %124 = vsyncadd [#allocation5], 4294967280 }
  0x1b   :  { %125 = dma.done.wait [#allocation3], 256  }
  0x1c   :  { %126 = vsyncadd [#allocation3], 4294967040 }
  0x1d   :  { %34 = sfence }
  0x1e   :  { %s35_s30 = sld [smem:[#allocation2]]  ;;  %s65_s3 = sld [smem:[#allocation2 + $0x1]]  ;;  %v37_v0 = vld [vmem:[#allocation6] sm:$0xff]  ;;  %v38_v1 = vld [vmem:[#allocation6 + $0x8] sm:$0xff] }
  0x1f   :  { %s131_s4 = smov [#allocation7]  }
  0x20   :  { %s55_s5 = sshll.u32 %s131_s4, 4  ;;  %s56_s5 = int_to_ptr.vmem [resolvable:$true] %s55_s5 }
  0x21   :  { %s101_s1 = scalar_lea.vmem %s56_s5, 256  ;;  %p106_p12 = scmp.lt.s32.totalorder %s56_s5, %s56_s5 }
  0x22   :  { %p102_p11 = scmp.ne.s32.totalorder %s56_s5, %s101_s1  ;;  %p107_p13 = scmp.lt.s32.totalorder %s101_s1, %s101_s1 }
  0x24   :  { %v39_v2 = vstv %s35_s30  ;;  %v42_v3 = vstv %s65_s3  ;;  %p108_p0 = por %p107_p13, %p106_p12 }
  0x25   :  { %v40_v4 = vmul.f32 %v39_v2, %v37_v0  ;;  %v41_v5 = vmul.f32 %v39_v2, %v38_v1 }
  0x26   :  { %p109_p1 = pnand %p108_p0, %p102_p11 }
  0x27   :  { %v43_v6 = vsub.f32 %v42_v3, %v40_v4  ;;  %v44_v7 = vsub.f32 %v42_v3, %v41_v5 }
  0x29   :  { %v45_v8 = vmul.f32 %v43_v6, %v37_v0  ;;  %v46_v9 = vmul.f32 %v44_v7, %v38_v1 }
  0x2b   :  { %47 = vst [vmem:[#allocation7] sm:$0xff] %v45_v8  ;;  %48 = vst [vmem:[#allocation7 + $0x8] sm:$0xff] %v46_v9 }
  0x2c   :  { %112 = shalt.err (!%p109_p1)
}
  0x2d   :  { %s113_s8 = scalar_lea.hbm %s185_s2, 256 }
  0x2e   :  { %p114_p2 = scmp.ne.s32.totalorder %s185_s2, %s113_s8  ;;  %p117_p3 = scmp.lt.u32.totalorder %s113_s8, %s185_s2 }
  0x30   :  { %p119_p4 = pnand %p117_p3, %p114_p2 }
  0x32   :  { %122 = shalt.err (!%p119_p4)
}
  0x33   :  { %58 = dma.vmem_to_hbm [thread:$0]  %s56_s5, 256, %s185_s2, [#allocation4]  }
  0x34   :  { %127 = dma.done.wait [#allocation4], 256  }
  0x35   :  { %128 = vsyncadd [#allocation4], 4294967040 }
  0x36   :  { %62 = vsyncpa [#allocation3], 1 }
  0x37   :  { %63 = vsyncpa [#allocation4], 1 }
  0x38   :  { %64 = vsyncpa [#allocation5], 1 }

</bundles_post_ra>
